<compile_context>
chip_gen: v6e
topology: v6e:2x2x1
jax: 0.10.0
libtpu: 0.0.40
codegen_flags: <defaults>
</compile_context>

<pallas_src>
import functools
import math

import jax
import jax.numpy as jnp
from jax.experimental import pallas as pl
from jax.experimental.pallas import tpu as pltpu


def _round_up(v, m):
    return ((v + m - 1) // m) * m


# ----------------------------------------------------------------------------
# Wrapper: one pallas_call, batch split across `num_steps` parallel grid steps.
# ----------------------------------------------------------------------------
def graph_temporal_forward(x, P, num_steps=None):
    B, S, N = x.shape
    H = P["w_emb"].shape[1]
    out_len = P["w_fc"].shape[1]
    assert S >= 3, "tail-only TCN assumes seq_len >= 3"

    if num_steps is None:
        num_steps = 2 if (B >= 2 and B % 2 == 0) else 1   # 2 -> both v7x TCs busy
    assert B % num_steps == 0
    TB = B // num_steps                                    # batch elements per grid step

    out_pad = _round_up(out_len, 128)                      # lane-dense decoder output
    emb_rows = _round_up(N, 8)                             # 8-aligned sections in the slab

    # ---- batch-invariant precompute, hoisted out of the kernel --------------
    adj_sm = jax.nn.softmax(P["adj"].astype(jnp.float32), axis=1)   # exact softmax
    adj_tail = adj_sm[S - 3:S, :]                                    # only rows the tail needs

    # selmix @ emb_flat yields, in grouped order (all batches' row S-3, then S-2, then S-1):
    #   rows [0,3TB)  : emb at the three tail timesteps      (selection block-diag)
    #   rows [3TB,6TB): neighbor = adj_sm @ emb at those rows (mixing  block-diag)
    eye_tb = jnp.eye(TB, dtype=jnp.float32)
    onehot = (jnp.arange(S)[None, :] == (jnp.arange(3)[:, None] + (S - 3))).astype(jnp.float32)
    sel = (onehot[:, None, None, :] * eye_tb[None, :, :, None]).reshape(3 * TB, TB * S)
    mix = (adj_tail[:, None, None, :] * eye_tb[None, :, :, None]).reshape(3 * TB, TB * S)
    selmix = jnp.concatenate([sel, mix], axis=0)                     # (6*TB, TB*S)

    # ---- weights consolidated into 3 VMEM-resident slabs ---------------------
    wc1_flat = jnp.transpose(P["wc1"], (2, 1, 0)).reshape(3 * H, H)  # taps [t-1; t; t+1]
    wc2_flat = jnp.transpose(P["wc2"], (2, 1, 0)).reshape(3 * H, H)[:2 * H]  # t+1 tap hits pad
    w_emb_p = jnp.pad(P["w_emb"], ((0, emb_rows - N), (0, 0)))
    o_gnn = emb_rows
    o_c1 = o_gnn + 2 * H
    o_c2 = o_c1 + 3 * H
    wmat = jnp.concatenate([w_emb_p, P["w_gnn"], wc1_flat, wc2_flat], axis=0)    # (o_c2+2H, H)
    bias = jnp.concatenate([P["b_emb"], P["b_gnn"], P["bc1"], P["bc2"]], axis=0)  # (4, H)
    fc_buf = jnp.concatenate(
        [jnp.pad(P["w_fc"], ((0, 0), (0, out_pad - out_len))),
         jnp.pad(P["b_fc"], ((0, 0), (0, out_pad - out_len)))], axis=0)           # (H+1, out_pad)

    x_steps = x.astype(jnp.float32).reshape(num_steps, TB * S, N)

    def kernel(x_ref, sm_ref, w_ref, b_ref, fc_ref, o_ref):
        relu = lambda v: jnp.maximum(v, 0.0)
        dot = functools.partial(jnp.dot, preferred_element_type=jnp.float32)

        xb = x_ref[0]                                            # (TB*S, N)

        # node embedding for the whole step-batch in one matmul
        emb = dot(xb, w_ref[0:N]) + b_ref[0:1]                   # (TB*S, H)

        # tail-row selection + graph mixing folded into one block-diag matmul
        p = dot(sm_ref[...], emb)                                # (6*TB, H)
        emb_t, neigh_t = p[:3 * TB], p[3 * TB:]

        # GNN on cat([emb, neighbor], -1): one K=2H matmul
        g = relu(dot(jnp.concatenate([emb_t, neigh_t], axis=-1),
                     w_ref[o_gnn:o_gnn + 2 * H]) + b_ref[1:2])   # (3*TB, H)
        g0, g1, g2 = g[:TB], g[TB:2 * TB], g[2 * TB:]            # rows S-3, S-2, S-1

        # TCN layer 1, only the two rows layer 2 reads (K=3H / K=2H fused-tap matmuls)
        wc1 = w_ref[o_c1:o_c1 + 3 * H]
        y_m2 = relu(dot(jnp.concatenate([g0, g1, g2], axis=-1), wc1) + b_ref[2:3])       # t=S-2
        y_m1 = relu(dot(jnp.concatenate([g1, g2], axis=-1), wc1[:2 * H]) + b_ref[2:3])   # t=S-1

        # TCN layer 2, last timestep only (its t+1 tap multiplies zero padding)
        z = relu(dot(jnp.concatenate([y_m2, y_m1], axis=-1),
                     w_ref[o_c2:o_c2 + 2 * H]) + b_ref[3:4])     # (TB, H)

        # decoder (lane-padded to 128 for dense stores)
        o_ref[0] = (dot(z, fc_ref[0:H]) + fc_ref[H:H + 1]).astype(o_ref.dtype)

    out = pl.pallas_call(
        kernel,
        out_shape=jax.ShapeDtypeStruct((num_steps, TB, out_pad), jnp.float32),
        grid=(num_steps,),
        in_specs=[
            pl.BlockSpec((1, TB * S, N), lambda i: (i, 0, 0)),
            pl.BlockSpec(selmix.shape, lambda i: (0, 0)),
            pl.BlockSpec(wmat.shape, lambda i: (0, 0)),
            pl.BlockSpec(bias.shape, lambda i: (0, 0)),
            pl.BlockSpec(fc_buf.shape, lambda i: (0, 0)),
        ],
        out_specs=pl.BlockSpec((1, TB, out_pad), lambda i: (i, 0, 0)),
        compiler_params=pltpu.CompilerParams(dimension_semantics=("parallel",)),
    )(x_steps, selmix, wmat, bias, fc_buf)

    return out.reshape(B, out_pad)[:, :out_len]


# ----------------------------------------------------------------------------
# Deterministic parameter init (shapes follow the PyTorch module; Linear weights
# stored pre-transposed as (in, out), Conv1d weights PyTorch-native (Cout, Cin, K)).
# ----------------------------------------------------------------------------
def init_params(key, input_dim, output_len, hidden_dim=64, num_nodes=13):
    keys = iter(jax.random.split(key, 16))

    def u(shape, fan_in):
        b = 1.0 / math.sqrt(fan_in)
        return jax.random.uniform(next(keys), shape, jnp.float32, -b, b)

    P = {}
    P["w_emb"] = u((input_dim, hidden_dim), input_dim)
    P["b_emb"] = u((1, hidden_dim), input_dim)
    # Module inits adj to ones*0.1; use random values here so a wrong adj-row selection
    # would actually be caught by the reference check (all rows identical would hide it).
    P["adj"] = 0.1 * jax.random.normal(next(keys), (num_nodes, num_nodes), jnp.float32)
    P["w_gnn"] = u((2 * hidden_dim, hidden_dim), 2 * hidden_dim)
    P["b_gnn"] = u((1, hidden_dim), 2 * hidden_dim)
    P["wc1"] = u((hidden_dim, hidden_dim, 3), hidden_dim * 3)   # (Cout, Cin, K)
    P["bc1"] = u((1, hidden_dim), hidden_dim * 3)
    P["wc2"] = u((hidden_dim, hidden_dim, 3), hidden_dim * 3)
    P["bc2"] = u((1, hidden_dim), hidden_dim * 3)
    P["w_fc"] = u((hidden_dim, output_len), hidden_dim)
    P["b_fc"] = u((1, output_len), hidden_dim)
    return P


# ----------------------------------------------------------------------------
# Pure-JAX reference mirroring the PyTorch forward (full TCN, for correctness).
# ----------------------------------------------------------------------------
def reference_forward(x, P):
    emb = x @ P["w_emb"] + P["b_emb"]                       # (B, S, H)
    adj_sm = jax.nn.softmax(P["adj"], axis=1)
    neighbor = jnp.matmul(adj_sm, emb)                      # same broadcast as torch.matmul
    g = jax.nn.relu(jnp.concatenate([emb, neighbor], axis=-1) @ P["w_gnn"] + P["b_gnn"])

    z = jnp.transpose(g, (0, 2, 1))                         # (B, H, S) NCW

    def conv_relu(zz, w, b):
        y = jax.lax.conv_general_dilated(zz, w, (1,), [(1, 1)],
                                         dimension_numbers=("NCH", "OIH", "NCH"))
        return jax.nn.relu(y + b.reshape(1, -1, 1))

    z = conv_relu(z, P["wc1"], P["bc1"])
    z = conv_relu(z, P["wc2"], P["bc2"])
    last = jnp.transpose(z, (0, 2, 1))[:, -1, :]            # (B, H)
    return last @ P["w_fc"] + P["b_fc"]


# ----------------------------------------------------------------------------
if __name__ == "__main__":
    num_nodes = 13
    input_dim = num_nodes      # forward feeds x's last dim (num_nodes) into Linear(input_dim, H)
    seq_len = num_nodes        # torch.matmul(adj, x_emb) requires seq_len == num_nodes
    hidden_dim = 64
    output_len = 24
    B = 8                      # small batch; packed 4 per grid step (2 parallel steps)

    key = jax.random.PRNGKey(0)
    kx, kp = jax.random.split(key)
    x = jax.random.normal(kx, (B, seq_len, input_dim), jnp.float32)
    P = init_params(kp, input_dim, output_len, hidden_dim, num_nodes)

    fwd = jax.jit(graph_temporal_forward)
    out = jax.block_until_ready(fwd(x, P))

    ref = reference_forward(x, P)
    assert out.shape == (B, output_len)
    assert jnp.allclose(out, ref, atol=2e-3, rtol=2e-3), "Pallas output mismatch vs JAX reference"

    print("KERNEL_OK")
</pallas_src>

<mosaic_0001>
module attributes {stable_mosaic.version = 11 : i64} {
  func.func @kernel(%arg0: i32, %arg1: memref<1x52x13xf32, #tpu.memory_space<vmem>>, %arg2: memref<24x52xf32, #tpu.memory_space<vmem>>, %arg3: memref<464x64xf32, #tpu.memory_space<vmem>>, %arg4: memref<4x64xf32, #tpu.memory_space<vmem>>, %arg5: memref<65x128xf32, #tpu.memory_space<vmem>>, %arg6: memref<1x4x128xf32, #tpu.memory_space<vmem>>) attributes {dimension_semantics = [#tpu.dimension_semantics<parallel>], iteration_bounds = array<i64: 2>, scalar_prefetch = 0 : i64, scratch_operands = 0 : i64, tpu.core_type = #tpu.core_type<tc>, window_params = [{transform_indices = @transform_0, window_bounds = array<i64: 1, 52, 13>}, {pipeline_mode = #tpu.pipeline_mode<synchronous>, transform_indices = @transform_1, window_bounds = array<i64: 24, 52>}, {pipeline_mode = #tpu.pipeline_mode<synchronous>, transform_indices = @transform_2, window_bounds = array<i64: 464, 64>}, {pipeline_mode = #tpu.pipeline_mode<synchronous>, transform_indices = @transform_3, window_bounds = array<i64: 4, 64>}, {pipeline_mode = #tpu.pipeline_mode<synchronous>, transform_indices = @transform_4, window_bounds = array<i64: 65, 128>}, {transform_indices = @transform_5, window_bounds = array<i64: 1, 4, 128>}]} {
    %c0 = arith.constant 0 : index
    %c0_0 = arith.constant 0 : index
    %c0_1 = arith.constant 0 : index
    %0 = vector.load %arg1[%c0, %c0_0, %c0_1] : memref<1x52x13xf32, #tpu.memory_space<vmem>>, vector<1x52x13xf32>
    %1 = vector.shape_cast %0 : vector<1x52x13xf32> to vector<52x13xf32>
    %c0_2 = arith.constant 0 : index
    %c0_3 = arith.constant 0 : index
    %2 = vector.load %arg3[%c0_2, %c0_3] : memref<464x64xf32, #tpu.memory_space<vmem>>, vector<13x64xf32>
    %cst = arith.constant dense<0.000000e+00> : vector<52x64xf32>
    %3 = tpu.matmul %1, %2, %cst {dimension_numbers = #tpu.dot_dimension_numbers<[1], [0], [0], [1], [0, 0, 1, 1], [], []>} : vector<52x13xf32>, vector<13x64xf32>, vector<52x64xf32> -> vector<52x64xf32>
    %c0_4 = arith.constant 0 : index
    %c0_5 = arith.constant 0 : index
    %4 = vector.load %arg4[%c0_4, %c0_5] : memref<4x64xf32, #tpu.memory_space<vmem>>, vector<1x64xf32>
    %5 = vector.broadcast %4 : vector<1x64xf32> to vector<52x64xf32>
    %6 = arith.addf %3, %5 : vector<52x64xf32>
    %c0_6 = arith.constant 0 : index
    %c0_7 = arith.constant 0 : index
    %7 = vector.load %arg2[%c0_6, %c0_7] : memref<24x52xf32, #tpu.memory_space<vmem>>, vector<24x52xf32>
    %cst_8 = arith.constant dense<0.000000e+00> : vector<24x64xf32>
    %8 = tpu.matmul %7, %6, %cst_8 {dimension_numbers = #tpu.dot_dimension_numbers<[1], [0], [0], [1], [0, 0, 1, 1], [], []>} : vector<24x52xf32>, vector<52x64xf32>, vector<24x64xf32> -> vector<24x64xf32>
    %9 = vector.extract_strided_slice %8 {offsets = [0, 0], sizes = [12, 64], strides = [1, 1]} : vector<24x64xf32> to vector<12x64xf32>
    %10 = vector.extract_strided_slice %8 {offsets = [12, 0], sizes = [12, 64], strides = [1, 1]} : vector<24x64xf32> to vector<12x64xf32>
    %11 = tpu.concatenate %9, %10 in 1 : vector<12x64xf32>, vector<12x64xf32> -> vector<12x128xf32>
    %c16 = arith.constant 16 : index
    %c0_9 = arith.constant 0 : index
    %12 = vector.load %arg3[%c16, %c0_9] : memref<464x64xf32, #tpu.memory_space<vmem>>, vector<128x64xf32>
    %cst_10 = arith.constant dense<0.000000e+00> : vector<12x64xf32>
    %13 = tpu.matmul %11, %12, %cst_10 {dimension_numbers = #tpu.dot_dimension_numbers<[1], [0], [0], [1], [0, 0, 1, 1], [], []>} : vector<12x128xf32>, vector<128x64xf32>, vector<12x64xf32> -> vector<12x64xf32>
    %c1 = arith.constant 1 : index
    %c0_11 = arith.constant 0 : index
    %14 = vector.load %arg4[%c1, %c0_11] : memref<4x64xf32, #tpu.memory_space<vmem>>, vector<1x64xf32>
    %15 = vector.broadcast %14 : vector<1x64xf32> to vector<12x64xf32>
    %16 = arith.addf %13, %15 : vector<12x64xf32>
    %cst_12 = arith.constant 0.000000e+00 : f32
    %17 = vector.broadcast %cst_12 : f32 to vector<12x64xf32>
    %18 = arith.maximumf %16, %17 : vector<12x64xf32>
    %19 = vector.extract_strided_slice %18 {offsets = [0, 0], sizes = [4, 64], strides = [1, 1]} : vector<12x64xf32> to vector<4x64xf32>
    %20 = vector.extract_strided_slice %18 {offsets = [4, 0], sizes = [4, 64], strides = [1, 1]} : vector<12x64xf32> to vector<4x64xf32>
    %21 = vector.extract_strided_slice %18 {offsets = [8, 0], sizes = [4, 64], strides = [1, 1]} : vector<12x64xf32> to vector<4x64xf32>
    %c144 = arith.constant 144 : index
    %c0_13 = arith.constant 0 : index
    %22 = vector.load %arg3[%c144, %c0_13] : memref<464x64xf32, #tpu.memory_space<vmem>>, vector<192x64xf32>
    %23 = tpu.concatenate %19, %20, %21 in 1 : vector<4x64xf32>, vector<4x64xf32>, vector<4x64xf32> -> vector<4x192xf32>
    %cst_14 = arith.constant dense<0.000000e+00> : vector<4x64xf32>
    %24 = tpu.matmul %23, %22, %cst_14 {dimension_numbers = #tpu.dot_dimension_numbers<[1], [0], [0], [1], [0, 0, 1, 1], [], []>} : vector<4x192xf32>, vector<192x64xf32>, vector<4x64xf32> -> vector<4x64xf32>
    %c2 = arith.constant 2 : index
    %c0_15 = arith.constant 0 : index
    %25 = vector.load %arg4[%c2, %c0_15] : memref<4x64xf32, #tpu.memory_space<vmem>>, vector<1x64xf32>
    %26 = vector.broadcast %25 : vector<1x64xf32> to vector<4x64xf32>
    %27 = arith.addf %24, %26 : vector<4x64xf32>
    %cst_16 = arith.constant 0.000000e+00 : f32
    %28 = vector.broadcast %cst_16 : f32 to vector<4x64xf32>
    %29 = arith.maximumf %27, %28 : vector<4x64xf32>
    %30 = tpu.concatenate %20, %21 in 1 : vector<4x64xf32>, vector<4x64xf32> -> vector<4x128xf32>
    %31 = vector.extract_strided_slice %22 {offsets = [0, 0], sizes = [128, 64], strides = [1, 1]} : vector<192x64xf32> to vector<128x64xf32>
    %cst_17 = arith.constant dense<0.000000e+00> : vector<4x64xf32>
    %32 = tpu.matmul %30, %31, %cst_17 {dimension_numbers = #tpu.dot_dimension_numbers<[1], [0], [0], [1], [0, 0, 1, 1], [], []>} : vector<4x128xf32>, vector<128x64xf32>, vector<4x64xf32> -> vector<4x64xf32>
    %c2_18 = arith.constant 2 : index
    %c0_19 = arith.constant 0 : index
    %33 = vector.load %arg4[%c2_18, %c0_19] : memref<4x64xf32, #tpu.memory_space<vmem>>, vector<1x64xf32>
    %34 = vector.broadcast %33 : vector<1x64xf32> to vector<4x64xf32>
    %35 = arith.addf %32, %34 : vector<4x64xf32>
    %cst_20 = arith.constant 0.000000e+00 : f32
    %36 = vector.broadcast %cst_20 : f32 to vector<4x64xf32>
    %37 = arith.maximumf %35, %36 : vector<4x64xf32>
    %38 = tpu.concatenate %29, %37 in 1 : vector<4x64xf32>, vector<4x64xf32> -> vector<4x128xf32>
    %c336 = arith.constant 336 : index
    %c0_21 = arith.constant 0 : index
    %39 = vector.load %arg3[%c336, %c0_21] : memref<464x64xf32, #tpu.memory_space<vmem>>, vector<128x64xf32>
    %cst_22 = arith.constant dense<0.000000e+00> : vector<4x64xf32>
    %40 = tpu.matmul %38, %39, %cst_22 {dimension_numbers = #tpu.dot_dimension_numbers<[1], [0], [0], [1], [0, 0, 1, 1], [], []>} : vector<4x128xf32>, vector<128x64xf32>, vector<4x64xf32> -> vector<4x64xf32>
    %c3 = arith.constant 3 : index
    %c0_23 = arith.constant 0 : index
    %41 = vector.load %arg4[%c3, %c0_23] : memref<4x64xf32, #tpu.memory_space<vmem>>, vector<1x64xf32>
    %42 = vector.broadcast %41 : vector<1x64xf32> to vector<4x64xf32>
    %43 = arith.addf %40, %42 : vector<4x64xf32>
    %cst_24 = arith.constant 0.000000e+00 : f32
    %44 = vector.broadcast %cst_24 : f32 to vector<4x64xf32>
    %45 = arith.maximumf %43, %44 : vector<4x64xf32>
    %c0_25 = arith.constant 0 : index
    %c0_26 = arith.constant 0 : index
    %46 = vector.load %arg5[%c0_25, %c0_26] : memref<65x128xf32, #tpu.memory_space<vmem>>, vector<64x128xf32>
    %cst_27 = arith.constant dense<0.000000e+00> : vector<4x128xf32>
    %47 = tpu.matmul %45, %46, %cst_27 {dimension_numbers = #tpu.dot_dimension_numbers<[1], [0], [0], [1], [0, 0, 1, 1], [], []>} : vector<4x64xf32>, vector<64x128xf32>, vector<4x128xf32> -> vector<4x128xf32>
    %c64 = arith.constant 64 : index
    %c0_28 = arith.constant 0 : index
    %48 = vector.load %arg5[%c64, %c0_28] : memref<65x128xf32, #tpu.memory_space<vmem>>, vector<1x128xf32>
    %49 = vector.broadcast %48 : vector<1x128xf32> to vector<4x128xf32>
    %50 = arith.addf %47, %49 : vector<4x128xf32>
    %c0_29 = arith.constant 0 : index
    %c0_30 = arith.constant 0 : index
    %c0_31 = arith.constant 0 : index
    %51 = vector.load %arg6[%c0_29, %c0_30, %c0_31] : memref<1x4x128xf32, #tpu.memory_space<vmem>>, vector<1x4x128xf32>
    %52 = vector.shape_cast %51 : vector<1x4x128xf32> to vector<4x128xf32>
    %53 = vector.shape_cast %50 : vector<4x128xf32> to vector<1x4x128xf32>
    tpu.vector_store %arg6[%c0_29, %c0_30, %c0_31], %53 {strides = array<i32>} : memref<1x4x128xf32, #tpu.memory_space<vmem>>, vector<1x4x128xf32>,
    return
  }
  func.func @transform_0(%arg0: i32) -> (i32, i32, i32) {
    %c0_i32 = arith.constant 0 : i32
    %c0_i32_0 = arith.constant 0 : i32
    %c0_i32_1 = arith.constant 0 : i32
    return %arg0, %c0_i32, %c0_i32_0 : i32, i32, i32
  }
  func.func @transform_1(%arg0: i32) -> (i32, i32) {
    %c0_i32 = arith.constant 0 : i32
    %c0_i32_0 = arith.constant 0 : i32
    %c0_i32_1 = arith.constant 0 : i32
    return %c0_i32, %c0_i32_0 : i32, i32
  }
  func.func @transform_2(%arg0: i32) -> (i32, i32) {
    %c0_i32 = arith.constant 0 : i32
    %c0_i32_0 = arith.constant 0 : i32
    %c0_i32_1 = arith.constant 0 : i32
    return %c0_i32, %c0_i32_0 : i32, i32
  }
  func.func @transform_3(%arg0: i32) -> (i32, i32) {
    %c0_i32 = arith.constant 0 : i32
    %c0_i32_0 = arith.constant 0 : i32
    %c0_i32_1 = arith.constant 0 : i32
    return %c0_i32, %c0_i32_0 : i32, i32
  }
  func.func @transform_4(%arg0: i32) -> (i32, i32) {
    %c0_i32 = arith.constant 0 : i32
    %c0_i32_0 = arith.constant 0 : i32
    %c0_i32_1 = arith.constant 0 : i32
    return %c0_i32, %c0_i32_0 : i32, i32
  }
  func.func @transform_5(%arg0: i32) -> (i32, i32, i32) {
    %c0_i32 = arith.constant 0 : i32
    %c0_i32_0 = arith.constant 0 : i32
    %c0_i32_1 = arith.constant 0 : i32
    return %arg0, %c0_i32, %c0_i32_0 : i32, i32, i32
  }
}

</mosaic_0001>

<bundles_post_ra>
// kernel: graph_temporal_forward.1
= control target key start
LH: loop header
LB: loop body
LE: loop exit
PB: predicated region body
PF: predicated region fallthrough
CT: control target
= control target key end

     0   :  { %10 = vsyncpa [#allocation3], 0  ;;  %s1876_s0 = inlined_call_operand.vmem [shape: f32[2,52,13], index: 0, kind: input, shape index: {}]   ;;  %s1877_s1 = inlined_call_operand.vmem [shape: f32[24,52], index: 1, kind: input, shape index: {}]   ;;  %s1878_s2 = inlined_call_operand.vmem [shape: f32[464,64], index: 2, kind: input, shape index: {}]   ;;  %s1879_s3 = inlined_call_operand.vmem [shape: f32[4,64], index: 3, kind: input, shape index: {}]   ;;  %s1880_s4 = inlined_call_operand.vmem [shape: f32[65,128], index: 4, kind: input, shape index: {}]   ;;  %s1881_s5 = inlined_call_operand.hbm [shape: f32[2,4,128], index: 5, kind: output, shape index: {}]  }
   0x1   :  { %12 = vsyncpa [#allocation3 + $0x1], 0  ;;  %s1442_s18 = smov 0   ;;  %s1444_s19 = smov 0  }
   0x2   :  { %s1446_s20 = smov 0   ;;  %s1448_s21 = smov 0  }
   0x3 LB: > { %s1463_s22 = sadd.s32 4294967295, %s1406_s21   ;;  %s1017_s23 = sadd.s32 4294967294, %s1406_s21   ;;  %s1406_s21 = sphi %s1448_s21, %s1887_s21   ;;  %s1402_s20 = sphi %s1446_s20, %s1886_s20   ;;  %s1398_s19 = sphi %s1444_s19, %s1885_s19   ;;  %s1394_s18 = sphi %s1442_s18, %s1884_s18  }
   0x4   : > { %s1467_s24 = sadd.s32 1, %s1406_s21   ;;  %s135_s25 = sadd.s32 1, %s1402_s20 }
   0x5   : > { %s132_s26 = ssub.s32 %s1406_s21, %s1467_s24  ;;  %p145_p0 = scmp.ne.s32.totalorder %s1402_s20, %s1398_s19 }
   0x6   : > { %p133_p1 = scmp.eq.s32.totalorder %s132_s26, 0  ;;  %p146_p2 = scmp.eq.s32.totalorder %s1463_s22, 1 }
   0x7   : > { %p151_p3 = scmp.ne.s32.totalorder %s1398_s19, %s1394_s18  ;;  %p152_p4 = scmp.eq.s32.totalorder %s1017_s23, 1 }
   0x8   : > { %s1478_s27 = scalar_select %p133_p1, %s1402_s20, %s135_s25  }
   0x9   : > { %p1480_p5 = por %p146_p2, %p145_p0  ;;  %p1484_p6 = por %p152_p4, %p151_p3 }
   0xa   : > { %p1020_p7 = scmp.ge.s32.totalorder %s1406_s21, 1  ;;  %p190_p8 = scmp.lt.s32.totalorder %s1406_s21, 3 }
   0xc   : > { %p191_p9 = pnand %p1020_p7, %p190_p8 }
   0xd   : > { %p218_p10 = scmp.lt.s32.totalorder (!%p191_p9), %s1463_s22, 1  ;;  %s1410_s6 = smov (!%p191_p9), 64  }
   0xe   : > { %194 = sbr.rel (%p191_p9) target bundleno = 1618 (0x652), region = 40  ;;  %s215_s23 = sand.u32 (!%p191_p9), 1, %s1398_s19  }
   0xf   : > { %s1021_s25 = sshll.u32 (!%p191_p9), %s215_s23, 2  ;;  %s1043_s7 = sshll.u32 (!%p191_p9), %s1463_s22, 6 }
  0x10   : > { %s217_s8 = scalar_lea.vmem (!%p191_p9), [#allocation2], %s1021_s25  ;;  %s1841_s12 = scalar_lea.hbm (!%p191_p9), %s1881_s5, %s1043_s7 }
  0x13   : > { %v231_v0 = vld [vmem:[%s1878_s2 + $0x8] sm:$0x1f]  ;;  %vm259_vm0 = vcmask 1044480   ;;  %v1408_v1 = vmov 0.0   ;;  %v230_v2 = vld [vmem:[%s1878_s2] sm:$0xff]  ;;  %vm1409_vm1 = vmmov 0  }
  0x14   : > { %1126 = vmatprep.subr.mxu0 %v1408_v1  ;;  %1130 = vmatprep.mubr.msk.f32.mxu0 %vm1409_vm1, %v1408_v1  ;;  %s219_s9 = scalar_select %p218_p10, %s1463_s22, 1  ;;  %vm237_vm2 = vcmask 105472   ;;  %v1023_v22 = vld [vmem:[%s1879_s3] ss:$0 sm:$0xff]  ;;  %vm376_vm3 = vcmask 1043456   ;;  %vm366_vm4 = vcmask 424960  }
  0x15   : > { %1127 = vmatpush3.msk.msra.mxu0 %vm259_vm0, %v231_v0  ;;  %1151 = vmatprep.subr.mxu1 %v1408_v1  ;;  %v363_v32 = vld [vmem:[%s1877_s1] sm:$0xff]  ;;  %v364_v33 = vld [vmem:[%s1877_s1 + $0x8] sm:$0xff]  ;;  %v365_v34 = vld [vmem:[%s1877_s1 + $0x10] sm:$0xff]  ;;  %vm471_vm5 = vcmask 523264  }
  0x16   : > { %1128 = vmatprep.subr.mxu0 %v1408_v1  ;;  %1165 = vmatprep.mubr.msk.f32.mxu1 %vm1409_vm1, %v1408_v1  ;;  %s1298_s10 = smul.u32 56, %s219_s9  ;;  %v489_v35 = vld [vmem:[%s1878_s2 + $0x88] sm:$0xff]  ;;  %v488_v36 = vld [vmem:[%s1878_s2 + $0x80] sm:$0xff]  ;;  %v487_v37 = vld [vmem:[%s1878_s2 + $0x78] sm:$0xff]  ;;  %s958_s9 = sshll.u32 %s217_s8, 4  ;;  %s959_s9 = int_to_ptr.vmem [resolvable:$true] %s958_s9 }
  0x17   : > { %1129 = vmatpush3.msra.mxu0 %v230_v2  ;;  %v486_v38 = vld [vmem:[%s1878_s2 + $0x70] sm:$0xff]  ;;  %v485_v39 = vld [vmem:[%s1878_s2 + $0x68] sm:$0xff]  ;;  %v484_v40 = vld [vmem:[%s1878_s2 + $0x60] sm:$0xff]  ;;  %s1346_s14 = scalar_lea.vmem %s959_s9, 64 }
  0x18   : > { %s222_s13 = scalar_lea.vmem %s1876_s0, %s1298_s10  ;;  %1174 = vmatprep.subr.mxu0 %v489_v35  ;;  %v483_v41 = vld [vmem:[%s1878_s2 + $0x58] sm:$0xff]  ;;  %v482_v42 = vld [vmem:[%s1878_s2 + $0x50] sm:$0xff]  ;;  %v481_v43 = vld [vmem:[%s1878_s2 + $0x48] sm:$0xff]  ;;  %p1347_p11 = scmp.ne.s32.totalorder %s959_s9, %s1346_s14 }
  0x19   : > { %v223_v3 = vld [vmem:[%s222_s13] sm:$0xff]  ;;  %v224_v4 = vld [vmem:[%s222_s13 + $0x8] sm:$0xff]  ;;  %v225_v5 = vld [vmem:[%s222_s13 + $0x10] sm:$0xff] }
  0x1a   : > { %1131 = vmatmul.mubr.msk.f32.vlgmr.msra.gmra.mxu0 %vm237_vm2, %v223_v3  ;;  %v226_v6 = vld [vmem:[%s222_s13 + $0x18] sm:$0xff]  ;;  %v227_v7 = vld [vmem:[%s222_s13 + $0x20] sm:$0xff]  ;;  %v228_v8 = vld [vmem:[%s222_s13 + $0x28] sm:$0xff]  ;;  %p1348_p12 = pnand %p1347_p11, %p1480_p5 }
  0x1b   : > { %1133 = vmatprep.mubr.msk.f32.mxu0 %vm1409_vm1, %v1408_v1  ;;  %v229_v9 = vld [vmem:[%s222_s13 + $0x30] sm:$0xf]  ;;  %1175 = vmatpush3.msra.mxu0 %v489_v35  ;;  %v480_v44 = vld [vmem:[%s1878_s2 + $0x40] sm:$0xff]  ;;  %v479_v45 = vld [vmem:[%s1878_s2 + $0x38] sm:$0xff]  ;;  %s945_s13 = scalar_lea.sflag [#allocation3], %s215_s23 }
  0x1c   : > { %1176 = vmatprep.subr.mxu0 %v488_v36  ;;  %v478_v46 = vld [vmem:[%s1878_s2 + $0x30] sm:$0xff]  ;;  %v477_v47 = vld [vmem:[%s1878_s2 + $0x28] sm:$0xff]  ;;  %v476_v48 = vld [vmem:[%s1878_s2 + $0x20] sm:$0xff]  ;;  %p1349_p13 = pneg %p1348_p12 }
  0x1d   : > { %1177 = vmatpush3.msra.mxu0 %v488_v36  ;;  %v475_v50 = vld [vmem:[%s1878_s2 + $0x18] sm:$0xff]  ;;  %v474_v51 = vld [vmem:[%s1878_s2 + $0x10] sm:$0xff]  ;;  %v587_v3 = vld [vmem:[%s1878_s2 + $0x108] sm:$0xff] }
  0x1e   : > { %1134 = vmatmul.mubr.msk.f32.gmra.mxu0 %vm237_vm2, %v224_v4  ;;  %1178 = vmatprep.subr.mxu0 %v487_v37  ;;  %v586_v4 = vld [vmem:[%s1878_s2 + $0x100] sm:$0xff] }
  0x1f   : > { %1136 = vmatprep.mubr.msk.f32.mxu0 %vm1409_vm1, %v1408_v1  ;;  %1179 = vmatpush3.msra.mxu0 %v487_v37 }
  0x20   : > { %1180 = vmatprep.subr.mxu0 %v486_v38 }
  0x21   : > { %1181 = vmatpush3.msra.mxu0 %v486_v38 }
  0x22   : > { %1137 = vmatmul.mubr.msk.f32.gmra.mxu0 %vm237_vm2, %v225_v5  ;;  %1182 = vmatprep.subr.mxu0 %v485_v39  ;;  %v585_v5 = vld [vmem:[%s1878_s2 + $0xf8] sm:$0xff] }
  0x23   : > { %1139 = vmatprep.mubr.msk.f32.mxu0 %vm1409_vm1, %v1408_v1  ;;  %1183 = vmatpush3.msra.mxu0 %v485_v39 }
  0x24   : > { %1184 = vmatprep.subr.mxu0 %v484_v40 }
  0x25   : > { %1185 = vmatpush3.msra.mxu0 %v484_v40 }
  0x26   : > { %1140 = vmatmul.mubr.msk.f32.gmra.mxu0 %vm237_vm2, %v226_v6  ;;  %1186 = vmatprep.subr.mxu0 %v483_v41  ;;  %v584_v6 = vld [vmem:[%s1878_s2 + $0xf0] sm:$0xff] }
  0x27   : > { %1142 = vmatprep.mubr.msk.f32.mxu0 %vm1409_vm1, %v1408_v1  ;;  %1187 = vmatpush3.msra.mxu0 %v483_v41  ;;  %v780_v41 = vld [vmem:[%s1878_s2 + $0x1c8] sm:$0xff] }
  0x28   : > { %1188 = vmatprep.subr.mxu0 %v482_v42 }
  0x29   : > { %1189 = vmatpush3.msra.mxu0 %v482_v42  ;;  %v779_v42 = vld [vmem:[%s1878_s2 + $0x1c0] sm:$0xff] }
  0x2a   : > { %1143 = vmatmul.mubr.msk.f32.gmra.mxu0 %vm237_vm2, %v227_v7  ;;  %1190 = vmatprep.subr.mxu0 %v481_v43  ;;  %v583_v7 = vld [vmem:[%s1878_s2 + $0xe8] sm:$0xff] }
  0x2b   : > { %1145 = vmatprep.mubr.msk.f32.mxu0 %vm1409_vm1, %v1408_v1  ;;  %1191 = vmatpush3.msra.mxu0 %v481_v43  ;;  %v778_v43 = vld [vmem:[%s1878_s2 + $0x1b8] sm:$0xff] }
  0x2c   : > { %1192 = vmatprep.subr.mxu0 %v480_v44 }
  0x2d   : > { %1193 = vmatpush3.msra.mxu0 %v480_v44  ;;  %v777_v44 = vld [vmem:[%s1878_s2 + $0x1b0] sm:$0xff] }
  0x2e   : > { %1146 = vmatmul.mubr.msk.f32.gmra.mxu0 %vm237_vm2, %v228_v8  ;;  %1194 = vmatprep.subr.mxu0 %v479_v45  ;;  %v582_v8 = vld [vmem:[%s1878_s2 + $0xe0] sm:$0xff] }
  0x2f   : > { %1148 = vmatprep.mubr.msk.f32.mxu0 %vm1409_vm1, %v1408_v1  ;;  %1195 = vmatpush3.msra.mxu0 %v479_v45  ;;  %v776_v45 = vld [vmem:[%s1878_s2 + $0x1a8] sm:$0xff] }
  0x30   : > { %1196 = vmatprep.subr.mxu0 %v478_v46 }
  0x31   : > { %1197 = vmatpush3.msra.mxu0 %v478_v46  ;;  %v775_v46 = vld [vmem:[%s1878_s2 + $0x1a0] sm:$0xff] }
  0x32   : > { %1149 = vmatmul.mubr.msk.f32.gmra.mxu0 %vm237_vm2, %v229_v9  ;;  %1198 = vmatprep.subr.mxu0 %v477_v47  ;;  %v581_v9 = vld [vmem:[%s1878_s2 + $0xd8] sm:$0xff] }
  0x33   : > { %1199 = vmatpush3.msra.mxu0 %v477_v47  ;;  %v774_v47 = vld [vmem:[%s1878_s2 + $0x198] sm:$0xff] }
  0x34   : > { %1200 = vmatprep.subr.mxu0 %v476_v48 }
  0x35   : > { %1201 = vmatpush3.msra.mxu0 %v476_v48  ;;  %v773_v48 = vld [vmem:[%s1878_s2 + $0x190] sm:$0xff] }
  0x36   : > { %1202 = vmatprep.subr.mxu0 %v475_v50 }
  0x37   : > { %1203 = vmatpush3.msra.mxu0 %v475_v50  ;;  %v771_v50 = vld [vmem:[%s1878_s2 + $0x180] sm:$0xff] }
  0x38   : > { %1204 = vmatprep.subr.mxu0 %v474_v51 }
  0x39   : > { %1205 = vmatpush3.msra.mxu0 %v474_v51  ;;  %v770_v51 = vld [vmem:[%s1878_s2 + $0x178] sm:$0xff] }
  0x3a   : > { %1209 = vmatprep.subr.mxu0 %v1408_v1 }
  0xda   : > { %v329_v10 = vpop.f32.mrf.mxu0 }
  0xdb   : > { %v330_v31 = vadd.f32 %v1023_v22, %v329_v10  ;;  %v580_v10 = vld [vmem:[%s1878_s2 + $0xd0] sm:$0xff] }
  0xdc   : > { %v1132_v11 = vpop.f32.mrf.mxu0 }
  0xdd   : > { %v579_v11 = vld [vmem:[%s1878_s2 + $0xc8] sm:$0xff] }
  0xde   : > { %v334_v12 = vpop.f32.mrf.mxu0 }
  0xdf   : > { %v335_v30 = vadd.f32 %v1023_v22, %v334_v12  ;;  %v578_v12 = vld [vmem:[%s1878_s2 + $0xc0] sm:$0xff] }
  0xe0   : > { %v1135_v13 = vpop.f32.mrf.mxu0 }
  0xe1   : > { %v577_v13 = vld [vmem:[%s1878_s2 + $0xb8] sm:$0xff] }
  0xe2   : > { %v339_v14 = vpop.f32.mrf.mxu0 }
  0xe3   : > { %v340_v29 = vadd.f32 %v1023_v22, %v339_v14  ;;  %v576_v14 = vld [vmem:[%s1878_s2 + $0xb0] sm:$0xff] }
  0xe4   : > { %v1138_v15 = vpop.f32.mrf.mxu0 }
  0xe5   : > { %v575_v15 = vld [vmem:[%s1878_s2 + $0xa8] sm:$0xff] }
  0xe6   : > { %v344_v16 = vpop.f32.mrf.mxu0 }
  0xe7   : > { %v345_v28 = vadd.f32 %v1023_v22, %v344_v16  ;;  %v574_v16 = vld [vmem:[%s1878_s2 + $0xa0] sm:$0xff] }
  0xe8   : > { %v1141_v17 = vpop.f32.mrf.mxu0 }
  0xe9   : > { %v573_v17 = vld [vmem:[%s1878_s2 + $0x98] sm:$0xff] }
  0xea   : > { %v349_v18 = vpop.f32.mrf.mxu0 }
  0xeb   : > { %v350_v27 = vadd.f32 %v1023_v22, %v349_v18  ;;  %v572_v18 = vld [vmem:[%s1878_s2 + $0x90] sm:$0xff] }
  0xec   : > { %v1144_v19 = vpop.f32.mrf.mxu0 }
  0xed   : > { %v595_v19 = vld [vmem:[%s1878_s2 + $0x148] sm:$0xff] }
  0xee   : > { %v354_v20 = vpop.f32.mrf.mxu0 }
  0xef   : > { %v355_v26 = vadd.f32 %v1023_v22, %v354_v20  ;;  %v594_v20 = vld [vmem:[%s1878_s2 + $0x140] sm:$0xff] }
  0xf0   : > { %v1147_v21 = vpop.f32.mrf.mxu0 }
  0xf1   : > { %v593_v21 = vld [vmem:[%s1878_s2 + $0x138] sm:$0xff] }
  0xf2   : > { %v359_v23 = vpop.f32.mrf.mxu0 }
  0xf3   : > { %v360_v24 = vadd.f32 %v1023_v22, %v359_v23  ;;  %v592_v22 = vld [vmem:[%s1878_s2 + $0x130] sm:$0xff]  ;;  %v591_v23 = vld [vmem:[%s1878_s2 + $0x128] sm:$0xff] }
  0xf4   : > { %v1150_v25 = vpop.f32.mrf.mxu0 }
  0xf5   : > { %1152 = vmatpush3.msk.msra.mxu1 %vm376_vm3, %v360_v24  ;;  %v590_v24 = vld [vmem:[%s1878_s2 + $0x120] sm:$0xff]  ;;  %v589_v25 = vld [vmem:[%s1878_s2 + $0x118] sm:$0xff] }
  0xf6   : > { %1153 = vmatprep.subr.mxu1 %v1408_v1 }
  0xf7   : > { %1154 = vmatpush3.msra.mxu1 %v355_v26  ;;  %v588_v26 = vld [vmem:[%s1878_s2 + $0x110] sm:$0xff] }
  0xf8   : > { %1155 = vmatprep.subr.mxu1 %v1408_v1 }
  0xf9   : > { %1156 = vmatpush3.msra.mxu1 %v350_v27  ;;  %v1036_v27 = vld [vmem:[%s1879_s3 + $0x1] ss:$0 sm:$0xff] }
  0xfa   : > { %1157 = vmatprep.subr.mxu1 %v1408_v1 }
  0xfb   : > { %1158 = vmatpush3.msra.mxu1 %v345_v28 }
  0xfc   : > { %1159 = vmatprep.subr.mxu1 %v1408_v1 }
  0xfd   : > { %1160 = vmatpush3.msra.mxu1 %v340_v29 }
  0xfe   : > { %1161 = vmatprep.subr.mxu1 %v1408_v1 }
  0xff   : > { %1162 = vmatpush3.msra.mxu1 %v335_v30 }
 0x100   : > { %1163 = vmatprep.subr.mxu1 %v1408_v1 }
 0x101   : > { %1164 = vmatpush3.msra.mxu1 %v330_v31 }
 0x102   : > { %1166 = vmatmul.mubr.msk.f32.vlgmr.msra.gmra.mxu1 %vm366_vm4, %v363_v32  ;;  %610 = vmatprep.subr.mxu1 %v1408_v1 }
 0x103   : > { %1168 = vmatprep.mubr.msk.f32.mxu1 %vm1409_vm1, %v1408_v1  ;;  %611 = vmatpush1.msra.mxu1 %v587_v3 }
 0x104   : > { %612 = vmatprep.subr.mxu1 %v1408_v1 }
 0x105   : > { %613 = vmatpush1.msra.mxu1 %v586_v4 }
 0x106   : > { %1169 = vmatmul.mubr.msk.f32.gmra.mxu1 %vm366_vm4, %v364_v33  ;;  %614 = vmatprep.subr.mxu1 %v1408_v1 }
 0x107   : > { %1171 = vmatprep.mubr.msk.f32.mxu1 %vm1409_vm1, %v1408_v1  ;;  %615 = vmatpush1.msra.mxu1 %v585_v5 }
 0x108   : > { %616 = vmatprep.subr.mxu1 %v1408_v1 }
 0x109   : > { %617 = vmatpush1.msra.mxu1 %v584_v6 }
 0x10a   : > { %1172 = vmatmul.mubr.msk.f32.gmra.mxu1 %vm366_vm4, %v365_v34  ;;  %618 = vmatprep.subr.mxu1 %v1408_v1 }
 0x10b   : > { %619 = vmatpush1.msra.mxu1 %v583_v7 }
 0x10c   : > { %620 = vmatprep.subr.mxu1 %v1408_v1 }
 0x10d   : > { %621 = vmatpush1.msra.mxu1 %v582_v8 }
 0x10e   : > { %622 = vmatprep.subr.mxu1 %v1408_v1 }
 0x10f   : > { %623 = vmatpush1.msra.mxu1 %v581_v9 }
 0x110   : > { %624 = vmatprep.subr.mxu1 %v1408_v1 }
 0x111   : > { %625 = vmatpush1.msra.mxu1 %v580_v10 }
 0x112   : > { %626 = vmatprep.subr.mxu1 %v1408_v1 }
 0x113   : > { %627 = vmatpush1.msra.mxu1 %v579_v11 }
 0x114   : > { %628 = vmatprep.subr.mxu1 %v1408_v1 }
 0x115   : > { %629 = vmatpush1.msra.mxu1 %v578_v12 }
 0x116   : > { %630 = vmatprep.subr.mxu1 %v1408_v1 }
 0x117   : > { %631 = vmatpush1.msra.mxu1 %v577_v13 }
 0x118   : > { %632 = vmatprep.subr.mxu1 %v1408_v1 }
 0x119   : > { %633 = vmatpush1.msra.mxu1 %v576_v14 }
 0x11a   : > { %634 = vmatprep.subr.mxu1 %v1408_v1 }
 0x11b   : > { %635 = vmatpush1.msra.mxu1 %v575_v15 }
 0x11c   : > { %636 = vmatprep.subr.mxu1 %v1408_v1 }
 0x11d   : > { %637 = vmatpush1.msra.mxu1 %v574_v16 }
 0x11e   : > { %638 = vmatprep.subr.mxu1 %v1408_v1 }
 0x11f   : > { %639 = vmatpush1.msra.mxu1 %v573_v17 }
 0x120   : > { %640 = vmatprep.subr.mxu1 %v1408_v1 }
 0x121   : > { %641 = vmatpush1.msra.mxu1 %v572_v18 }
 0x122   : > { %658 = vmatprep.subr.mxu1 %v1408_v1 }
 0x123   : > { %659 = vmatpush2.msra.mxu1 %v595_v19 }
 0x124   : > { %660 = vmatprep.subr.mxu1 %v1408_v1 }
 0x125   : > { %661 = vmatpush2.msra.mxu1 %v594_v20 }
 0x126   : > { %662 = vmatprep.subr.mxu1 %v1408_v1 }
 0x127   : > { %663 = vmatpush2.msra.mxu1 %v593_v21 }
 0x128   : > { %664 = vmatprep.subr.mxu1 %v1408_v1 }
 0x129   : > { %665 = vmatpush2.msra.mxu1 %v592_v22 }
 0x12a   : > { %666 = vmatprep.subr.mxu1 %v1408_v1 }
 0x12b   : > { %667 = vmatpush2.msra.mxu1 %v591_v23 }
 0x12c   : > { %668 = vmatprep.subr.mxu1 %v1408_v1 }
 0x12d   : > { %669 = vmatpush2.msra.mxu1 %v590_v24 }
 0x12e   : > { %670 = vmatprep.subr.mxu1 %v1408_v1 }
 0x12f   : > { %671 = vmatpush2.msra.mxu1 %v589_v25 }
 0x130   : > { %672 = vmatprep.subr.mxu1 %v1408_v1 }
 0x131   : > { %673 = vmatpush2.msra.mxu1 %v588_v26 }
 0x132   : > { %1244 = vmatprep.subr.mxu1 %v1408_v1 }
 0x1c2   : > { %v446_v49 = vpop.f32.mrf.mxu1 }
 0x1c4   : > { %v1167_v52 = vpop.f32.mrf.mxu1 }
 0x1c5   : > { %v769_v52 = vld [vmem:[%s1878_s2 + $0x170] sm:$0xff] }
 0x1c6   : > { %v451_v53 = vpop.f32.mrf.mxu1 }
 0x1c7   : > { %v462_v56 = vrot.slane %v451_v53, 4 }
 0x1c8   : > { %v1170_v54 = vpop.f32.mrf.mxu1 }
 0x1c9   : > { %v767_v54 = vld [vmem:[%s1878_s2 + $0x160] sm:$0xff] }
 0x1ca   : > { %v456_v55 = vpop.f32.mrf.mxu1 }
 0x1cb   : > { %v463_v57 = vrot.slane %v456_v55, 4  ;;  %v766_v55 = vld [vmem:[%s1878_s2 + $0x158] sm:$0xff] }
 0x1cc   : > { %v1173_v58 = vpop.f32.mrf.mxu1 }
 0x1cd   : > { %v464_v59 = vsel %vm376_vm3, %v462_v56, %v463_v57  ;;  %v765_v56 = vld [vmem:[%s1878_s2 + $0x150] sm:$0xff] }
 0x1ce   : > { %v1341_v60 = vpack.i.bf16 %v463_v57, %v464_v59  ;;  %v864_v57 = vld [vmem:[%s1880_s4 + $0x38] sm:$0xff]  ;;  %v863_v58 = vld [vmem:[%s1880_s4 + $0x30] sm:$0xff]  ;;  %v862_v59 = vld [vmem:[%s1880_s4 + $0x28] sm:$0xff] }
 0x1d0   : > { %1342 = vrot.lane.b32.xlu0 %v1341_v60, %s1410_s6  ;;  %v861_v60 = vld [vmem:[%s1880_s4 + $0x20] sm:$0xff] }
 0x242   : > { %v1343_v61 = vpop.permute.xlu0 %1342 }
 0x243   : > { %v1345_v62 = vunpack.i.h.bf16 %v1343_v61  ;;  %v1344_v63 = vunpack.i.l.bf16 %v1343_v61  ;;  %v1037_v61 = vld [vmem:[%s1879_s3 + $0x2] ss:$0 sm:$0xff] }
 0x245   : > { %v472_v0 = vsel %vm471_vm5, %v446_v49, %v1344_v63  ;;  %v473_v2 = vsel %vm471_vm5, %v451_v53, %v1345_v62  ;;  %v772_v49 = vld [vmem:[%s1878_s2 + $0x188] sm:$0xff]  ;;  %v860_v62 = vld [vmem:[%s1880_s4 + $0x18] sm:$0xff] }
 0x246   : > { %1206 = vmatprep.mubr.f32.mxu0 %v472_v0  ;;  %v768_v53 = vld [vmem:[%s1878_s2 + $0x168] sm:$0xff] }
 0x247   : > { %1207 = vmatmul.mubr.f32.vlgmr.msra.gmra.mxu0 %v473_v2 }
 0x248   : > { %1241 = vmatprep.mubr.msk.f32.mxu0 %vm1409_vm1, %v1408_v1  ;;  %1210 = vmatpush3.msra.mxu0 %v587_v3 }
 0x249   : > { %1211 = vmatprep.subr.mxu0 %v1408_v1 }
 0x24a   : > { %1212 = vmatpush3.msra.mxu0 %v586_v4 }
 0x24b   : > { %1213 = vmatprep.subr.mxu0 %v1408_v1 }
 0x24c   : > { %1214 = vmatpush3.msra.mxu0 %v585_v5 }
 0x24d   : > { %1215 = vmatprep.subr.mxu0 %v1408_v1 }
 0x24e   : > { %1216 = vmatpush3.msra.mxu0 %v584_v6 }
 0x24f   : > { %1217 = vmatprep.subr.mxu0 %v1408_v1 }
 0x250   : > { %1218 = vmatpush3.msra.mxu0 %v583_v7 }
 0x251   : > { %1219 = vmatprep.subr.mxu0 %v1408_v1 }
 0x252   : > { %1220 = vmatpush3.msra.mxu0 %v582_v8 }
 0x253   : > { %1221 = vmatprep.subr.mxu0 %v1408_v1 }
 0x254   : > { %1222 = vmatpush3.msra.mxu0 %v581_v9 }
 0x255   : > { %1223 = vmatprep.subr.mxu0 %v1408_v1 }
 0x256   : > { %1224 = vmatpush3.msra.mxu0 %v580_v10  ;;  %v859_v10 = vld [vmem:[%s1880_s4 + $0x10] sm:$0xff] }
 0x257   : > { %1225 = vmatprep.subr.mxu0 %v1408_v1 }
 0x258   : > { %1226 = vmatpush3.msra.mxu0 %v579_v11  ;;  %v858_v11 = vld [vmem:[%s1880_s4 + $0x8] sm:$0xff] }
 0x259   : > { %1227 = vmatprep.subr.mxu0 %v1408_v1 }
 0x25a   : > { %1228 = vmatpush3.msra.mxu0 %v578_v12  ;;  %v857_v12 = vld [vmem:[%s1880_s4] sm:$0xff] }
 0x25b   : > { %1229 = vmatprep.subr.mxu0 %v1408_v1 }
 0x25c   : > { %1230 = vmatpush3.msra.mxu0 %v577_v13  ;;  %v1039_v13 = vld [vmem:[%s1879_s3 + $0x3] ss:$0 sm:$0xff] }
 0x25d   : > { %1231 = vmatprep.subr.mxu0 %v1408_v1 }
 0x25e   : > { %1232 = vmatpush3.msra.mxu0 %v576_v14 }
 0x25f   : > { %1233 = vmatprep.subr.mxu0 %v1408_v1 }
 0x260   : > { %1234 = vmatpush3.msra.mxu0 %v575_v15 }
 0x261   : > { %1235 = vmatprep.subr.mxu0 %v1408_v1 }
 0x262   : > { %1236 = vmatpush3.msra.mxu0 %v574_v16 }
 0x263   : > { %1237 = vmatprep.subr.mxu0 %v1408_v1 }
 0x264   : > { %1238 = vmatpush3.msra.mxu0 %v573_v17 }
 0x265   : > { %1239 = vmatprep.subr.mxu0 %v1408_v1 }
 0x266   : > { %1240 = vmatpush3.msra.mxu0 %v572_v18 }
 0x267   : > { %1279 = vmatprep.subr.mxu0 %v1408_v1 }
 0x307   : > { %v1208_v28 = vpop.f32.mrf.mxu0 }
 0x308   : > { %v567_v29 = vadd.f32 %v1208_v28, %v1036_v27 }
 0x309   : > { %v561_v30 = vpop.f32.mrf.mxu0 }
 0x30a   : > { %v571_v31 = vmax.f32 %v567_v29, 0.0  ;;  %v562_v32 = vadd.f32 %v1036_v27, %v561_v30 }
 0x30c   : > { %v681_v33 = vrot.slane %v571_v31, 4  ;;  %v570_v34 = vmax.f32 %v562_v32, 0.0  ;;  %1038 = vmatprep.mubr.msk.f32.mxu1 %vm471_vm5, %v571_v31 }
 0x30e   : > { %682 = vrot.lane.b32.xlu0 %v681_v33, %s1410_s6  ;;  %v597_v35 = vrot.slane %v570_v34, 4 }
 0x310   : > { %598 = vrot.lane.b32.xlu1 %v597_v35, %s1410_s6 }
 0x380   : > { %v683_v36 = vpop.permute.xlu0 %682 }
 0x381   : > { %v685_v37 = vsel %vm471_vm5, %v570_v34, %v683_v36 }
 0x382   : > { %v687_v38 = vrot.slane %v685_v37, 4  ;;  %v599_v39 = vpop.permute.xlu1 %598 }
 0x383   : > { %v601_v40 = vsel %vm471_vm5, %v570_v34, %v599_v39 }
 0x384   : > { %675 = vmatmul.mubr.f32.vlgmr.msra.gmra.mxu1 %v601_v40  ;;  %1242 = vmatmul.mubr.f32.vlgmr.msra.gmra.mxu0 %v687_v38 }
 0x385   : > { %1276 = vmatprep.mubr.msk.f32.mxu1 %vm1409_vm1, %v1408_v1  ;;  %1295 = vmatprep.mubr.msk.f32.mxu0 %vm1409_vm1, %v1408_v1 }
 0x386   : > { %1245 = vmatpush3.msra.mxu1 %v780_v41  ;;  %1280 = vmatpush3.msra.mxu0 %v864_v57 }
 0x387   : > { %1246 = vmatprep.subr.mxu1 %v1408_v1  ;;  %1281 = vmatprep.subr.mxu0 %v1408_v1 }
 0x388   : > { %1247 = vmatpush3.msra.mxu1 %v779_v42  ;;  %1282 = vmatpush3.msra.mxu0 %v863_v58 }
 0x389   : > { %1248 = vmatprep.subr.mxu1 %v1408_v1  ;;  %1283 = vmatprep.subr.mxu0 %v1408_v1 }
 0x38a   : > { %1249 = vmatpush3.msra.mxu1 %v778_v43  ;;  %1284 = vmatpush3.msra.mxu0 %v862_v59 }
 0x38b   : > { %1250 = vmatprep.subr.mxu1 %v1408_v1  ;;  %1285 = vmatprep.subr.mxu0 %v1408_v1 }
 0x38c   : > { %1251 = vmatpush3.msra.mxu1 %v777_v44  ;;  %1286 = vmatpush3.msra.mxu0 %v861_v60 }
 0x38d   : > { %1252 = vmatprep.subr.mxu1 %v1408_v1  ;;  %1287 = vmatprep.subr.mxu0 %v1408_v1 }
 0x38e   : > { %1253 = vmatpush3.msra.mxu1 %v776_v45  ;;  %1288 = vmatpush3.msra.mxu0 %v860_v62 }
 0x38f   : > { %1254 = vmatprep.subr.mxu1 %v1408_v1  ;;  %1289 = vmatprep.subr.mxu0 %v1408_v1 }
 0x390   : > { %1255 = vmatpush3.msra.mxu1 %v775_v46  ;;  %1290 = vmatpush3.msra.mxu0 %v859_v10 }
 0x391   : > { %1256 = vmatprep.subr.mxu1 %v1408_v1  ;;  %1291 = vmatprep.subr.mxu0 %v1408_v1 }
 0x392   : > { %1257 = vmatpush3.msra.mxu1 %v774_v47  ;;  %1292 = vmatpush3.msra.mxu0 %v858_v11 }
 0x393   : > { %1258 = vmatprep.subr.mxu1 %v1408_v1  ;;  %1293 = vmatprep.subr.mxu0 %v1408_v1 }
 0x394   : > { %1259 = vmatpush3.msra.mxu1 %v773_v48  ;;  %1294 = vmatpush3.msra.mxu0 %v857_v12 }
 0x395   : > { %1260 = vmatprep.subr.mxu1 %v1408_v1 }
 0x396   : > { %1261 = vmatpush3.msra.mxu1 %v772_v49 }
 0x397   : > { %1262 = vmatprep.subr.mxu1 %v1408_v1 }
 0x398   : > { %1263 = vmatpush3.msra.mxu1 %v771_v50 }
 0x399   : > { %1264 = vmatprep.subr.mxu1 %v1408_v1 }
 0x39a   : > { %1265 = vmatpush3.msra.mxu1 %v770_v51 }
 0x39b   : > { %1266 = vmatprep.subr.mxu1 %v1408_v1 }
 0x39c   : > { %1267 = vmatpush3.msra.mxu1 %v769_v52 }
 0x39d   : > { %1268 = vmatprep.subr.mxu1 %v1408_v1 }
 0x39e   : > { %1269 = vmatpush3.msra.mxu1 %v768_v53 }
 0x39f   : > { %1270 = vmatprep.subr.mxu1 %v1408_v1 }
 0x3a0   : > { %1271 = vmatpush3.msra.mxu1 %v767_v54 }
 0x3a1   : > { %1272 = vmatprep.subr.mxu1 %v1408_v1 }
 0x3a2   : > { %1273 = vmatpush3.msra.mxu1 %v766_v55 }
 0x3a3   : > { %1274 = vmatprep.subr.mxu1 %v1408_v1  ;;  %v1040_v1 = vld [vmem:[%s1880_s4 + $0x40] ss:$0 sm:$0xff] }
 0x3a4   : > { %1275 = vmatpush3.msra.mxu1 %v765_v56 }
 0x444   : > { %v676_v63 = vpop.f32.mrf.mxu1  ;;  %v755_v0 = vpop.f32.mrf.mxu0 }
 0x445   : > { %v677_v2 = vadd.f32 %v1037_v61, %v676_v63  ;;  %v756_v3 = vadd.f32 %v1037_v61, %v755_v0 }
 0x446   : > { %v678_v4 = vpop.f32.mrf.mxu1  ;;  %v1243_v5 = vpop.f32.mrf.mxu0 }
 0x447   : > { %v759_v6 = vmax.f32 %v756_v3, 0.0  ;;  %v680_v7 = vmax.f32 %v677_v2, 0.0 }
 0x449   : > { %761 = vrot.lane.b32.xlu1 %v759_v6, %s1410_s6  ;;  %s1411_s6 = smov [#allocation2]  }
 0x44a   : > { %s1350_s22 = sshll.u32 %s1411_s6, 4  ;;  %s1351_s22 = int_to_ptr.vmem [resolvable:$false] %s1350_s22 }
 0x44b   : > { %s1352_s15 = scalar_lea.vmem %s1351_s22, 128  ;;  %p1353_p0 = scmp.lt.s32.totalorder %s959_s9, %s1351_s22 }
 0x44c   : > { %p1354_p1 = scmp.lt.s32.totalorder %s1352_s15, %s1346_s14 }
 0x44e   : > { %p1355_p2 = por %p1354_p1, %p1353_p0 }
 0x450   : > { %p1356_p3 = pnand %p1355_p2, %p1349_p13 }
 0x4bb   : > { %v762_v8 = vpop.permute.xlu1 %761 }
 0x4bc   : > { %v764_v9 = vsel %vm471_vm5, %v680_v7, %v762_v8 }
 0x4bd   : > { %1277 = vmatmul.mubr.f32.vlgmr.msra.gmra.mxu1 %v764_v9 }
 0x57d   : > { %v852_v14 = vpop.f32.mrf.mxu1 }
 0x57e   : > { %v853_v15 = vadd.f32 %v1039_v13, %v852_v14 }
 0x57f   : > { %v1278_v16 = vpop.f32.mrf.mxu1 }
 0x580   : > { %v856_v17 = vmax.f32 %v853_v15, 0.0 }
 0x582   : > { %1296 = vmatmul.mubr.msk.f32.vlgmr.msra.gmra.mxu0 %vm471_vm5, %v856_v17 }
 0x642   : > { %v939_v18 = vpop.f32.mrf.mxu0 }
 0x643   : > { %v940_v19 = vadd.f32 %v1040_v1, %v939_v18 }
 0x644   : > { %v1297_v20 = vpop.f32.mrf.mxu0 }
 0x645   : > { %943 = vst [vmem:[%s217_s8] sm:$0xf] %v940_v19 }
 0x646   : > { %1359 = shalt.err (!%p1356_p3)
}
 0x647   : > { %s1360_s16 = scalar_lea.hbm %s1841_s12, 64  ;;  %s1364_s25 = scalar_lea.hbm %s1881_s5, 128 }
 0x648   : > { %p1361_p4 = scmp.ne.s32.totalorder %s1841_s12, %s1360_s16  ;;  %p1365_p9 = scmp.lt.s32.totalorder %s1841_s12, %s1881_s5 }
 0x649   : > { %p1366_p10 = scmp.lt.s32.totalorder %s1364_s25, %s1360_s16 }
 0x64a   : > { %p1362_p7 = pnand %p1361_p4, %p1480_p5 }
 0x64b   : > { %p1367_p11 = por %p1366_p10, %p1365_p9 }
 0x64c   : > { %p1363_p8 = pneg %p1362_p7 }
 0x64e   : > { %p1368_p12 = pnand %p1367_p11, %p1363_p8 }
 0x650   : > { %1371 = shalt.err (!%p1368_p12)
}
 0x651   : > { %1299 = dma.vmem_to_hbm [thread:$0]  (%p1480_p5), %s959_s9, 64, %s1841_s12, %s945_s13  }
 0x652 PF: > { %p1305_p13 = scmp.ge.s32.totalorder %s1406_s21, 2  ;;  %s970_s7 = sand.u32 1, %s1394_s18  }
 0x653   : > { %s971_s8 = scalar_lea.sflag [#allocation3], %s970_s7 }
 0x654   : > { %p1302_p0 = pnand %p1305_p13, %p1484_p6 }
 0x656   : > { %p1303_p1 = pneg %p1302_p0 }
 0x658   : > { %1389 = dma.done.wait (%p1303_p1), %s971_s8, 64  }
 0x659   : > { %1391 = vsyncadd (%p1303_p1), %s971_s8, 4294967232  ;;  %p15_p2 = scmp.ge.s32.totalorder %s1467_s24, 4   ;;  %s1884_s18 = smov %s1398_s19 }
 0x65a   : > { %s1885_s19 = smov %s1402_s20  ;;  %s1886_s20 = smov %s1478_s27 }
 0x65b   : > { %s1887_s21 = smov %s1467_s24  ;;  %17 = sbr.rel (!%p15_p2) target bundleno = 3 (0x3), region = 75 }
 0x660   :  { %976 = vsyncpa [#allocation3], 1 }
 0x661   :  { %978 = vsyncpa [#allocation3 + $0x1], 1 }

</bundles_post_ra>
